<compile_context>
chip_gen: v7x
topology: tpu7x:2x2x1
jax: 0.10.0
libtpu: 0.0.40
codegen_flags: <defaults>
</compile_context>

<pallas_src>
import jax
import jax.numpy as jnp
from jax.experimental import pallas as pl
from jax.experimental.pallas import tpu as pltpu

_LANES = 128  # lane-dense output slab width


# ---------------------------------------------------------------------------
# Fused kernel: both embedding branches + FC head in one pass.
#   x      : (2*Np, C*HW) bf16   rows [0:Np] = branch 1, [Np:2Np] = branch 2
#   w_big  : (C*HW, F)   bf16    repeat(w_emb / HW, HW) -> GAP fused into MXU
#   b_emb  : (1, F)      f32
#   w1a/w1b: (F, HID)    bf16    concat eliminated algebraically
#   b1, b2 : (1, HID)    f32
#   w2     : (HID, HID)  bf16
#   w3     : (HID, 128)  bf16    lane-replicated column
#   b3     : (1, 1)      f32     SMEM scalar
#   o      : (Np, 128)   f32     lane-dense slab; column 0 is the real output
# ---------------------------------------------------------------------------
def siamese_fused_kernel(x_ref, w_big_ref, b_emb_ref,
                         w1a_ref, w1b_ref, b1_ref,
                         w2_ref, b2_ref, w3_ref, b3_ref,
                         o_ref):
    n_pad = o_ref.shape[0]  # padded per-branch batch (multiple of 8)

    # --- shared trunk surrogate: GAP + 1x1 projection as ONE matmul ---------
    x = x_ref[...]                                            # (2Np, C*HW) bf16
    e = jnp.dot(x, w_big_ref[...],
                preferred_element_type=jnp.float32) + b_emb_ref[...]
    e = jnp.maximum(e, 0.0).astype(jnp.bfloat16)              # (2Np, F)

    # --- FC head; cat(e1, e2) @ W1 == e1 @ W1[:F] + e2 @ W1[F:] --------------
    e1 = e[:n_pad]                         # static, sublane-aligned slices
    e2 = e[n_pad:]
    h1 = (jnp.dot(e1, w1a_ref[...], preferred_element_type=jnp.float32)
          + jnp.dot(e2, w1b_ref[...], preferred_element_type=jnp.float32)
          + b1_ref[...])
    h1 = jnp.maximum(h1, 0.0).astype(jnp.bfloat16)            # (Np, HID)  [Dropout=id]

    h2 = jnp.dot(h1, w2_ref[...],
                 preferred_element_type=jnp.float32) + b2_ref[...]
    h2 = jnp.maximum(h2, 0.0).astype(jnp.bfloat16)            # (Np, HID)  [Dropout=id]

    # Lane-replicated w3 -> (Np, 128) slab straight off the MXU; SMEM scalar
    # bias; fully unmasked (8x128) store.
    o_ref[...] = (jnp.dot(h2, w3_ref[...], preferred_element_type=jnp.float32)
                  + b3_ref[0, 0])


# ---------------------------------------------------------------------------
# Wrapper: single pallas_call, whole arrays resident in VMEM (footprint <0.5 MiB).
# ---------------------------------------------------------------------------
@jax.jit
def siamese_forward(input1, input2, emb_params, head_params):
    w_emb, b_emb = emb_params
    w1, b1, w2, b2, w3, b3 = head_params

    n, c, h, w = input1.shape
    hw = h * w
    f = w_emb.shape[1]
    hid = w2.shape[0]
    n_pad = max(8, -(-n // 8) * 8)        # sublane-aligned per-branch batch
    bf16 = jnp.bfloat16

    # Batch both branches into one lane-dense (2*Np, C*HW) bf16 array.
    def prep(x):
        x2 = x.reshape(n, c * hw).astype(jnp.float32)
        return jnp.pad(x2, ((0, n_pad - n), (0, 0))).astype(bf16)
    x_cat = jnp.concatenate([prep(input1), prep(input2)], axis=0)

    # GAP + projection fused: repeat each channel row HW times, fold in the
    # exact 1/HW mean scale (power of two -> no rounding error).
    w_big = jnp.repeat((w_emb * (1.0 / hw)).astype(bf16), hw, axis=0)  # (C*HW, F)
    w1a = w1[:f].astype(bf16)                                          # (F, HID)
    w1b = w1[f:].astype(bf16)                                          # (F, HID)
    w2b = w2.astype(bf16)                                              # (HID, HID)
    w3r = jnp.broadcast_to(w3.astype(bf16), (hid, _LANES))             # (HID, 128)
    b3s = b3.reshape(1, 1).astype(jnp.float32)                         # SMEM scalar

    vmem = pl.BlockSpec(memory_space=pltpu.MemorySpace.VMEM)
    smem = pl.BlockSpec(memory_space=pltpu.MemorySpace.SMEM)

    out_pad = pl.pallas_call(
        siamese_fused_kernel,
        out_shape=jax.ShapeDtypeStruct((n_pad, _LANES), jnp.float32),
        in_specs=[vmem,                 # x_cat
                  vmem, vmem,           # w_big, b_emb
                  vmem, vmem, vmem,     # w1a, w1b, b1
                  vmem, vmem,           # w2, b2
                  vmem, smem],          # w3 (lane-replicated), b3 (SMEM scalar)
        out_specs=vmem,
    )(x_cat, w_big, b_emb.astype(jnp.float32),
      w1a, w1b, b1.astype(jnp.float32),
      w2b, b2.astype(jnp.float32), w3r, b3s)

    return out_pad[:n, :1]                      # (N, 1)


# ---------------------------------------------------------------------------
# Deterministic parameter init + demo run + pure-JAX reference check
# ---------------------------------------------------------------------------
if __name__ == "__main__":
    key = jax.random.PRNGKey(0)
    ks = jax.random.split(key, 10)

    # Small shapes: batch=2, channels=4, spatial=16x16, embedding F=32, hidden=256
    N, C, H, W = 2, 4, 16, 16
    F = 32          # surrogate for resnet fc_in_features (2048 in the original)
    HID = 256

    # surrogate embedding extractor params (shared between the two branches,
    # exactly like the shared resnet trunk)
    w_emb = jax.random.normal(ks[0], (C, F), jnp.float32) * 0.1
    b_emb = jax.random.normal(ks[1], (1, F), jnp.float32) * 0.01

    # FC head params (weights stored as (in, out) so y = x @ W + b)
    w1 = jax.random.normal(ks[2], (2 * F, HID), jnp.float32) * 0.05
    b1 = jax.random.normal(ks[3], (1, HID), jnp.float32) * 0.01
    w2 = jax.random.normal(ks[4], (HID, HID), jnp.float32) * 0.05
    b2 = jax.random.normal(ks[5], (1, HID), jnp.float32) * 0.01
    w3 = jax.random.normal(ks[6], (HID, 1), jnp.float32) * 0.05
    b3 = jax.random.normal(ks[7], (1, 1), jnp.float32) * 0.01

    input1 = jax.random.normal(ks[8], (N, C, H, W), jnp.float32)
    input2 = jax.random.normal(ks[9], (N, C, H, W), jnp.float32)

    out = siamese_forward(input1, input2,
                          (w_emb, b_emb),
                          (w1, b1, w2, b2, w3, b3))
    out = jax.block_until_ready(out)
    assert out.shape == (N, 1) and out.dtype == jnp.float32

    # pure-JAX reference (f32 activations, same bf16-rounded weights the kernel
    # uses; tolerance covers the kernel's bf16 activation casts)
    def reference(i1, i2):
        bf = jnp.bfloat16
        w_e = w_emb.astype(bf).astype(jnp.float32)
        w1f = w1.astype(bf).astype(jnp.float32)
        w2f = w2.astype(bf).astype(jnp.float32)
        w3f = w3.astype(bf).astype(jnp.float32)
        p1 = jnp.mean(i1.reshape(N, C, H * W), axis=2)
        p2 = jnp.mean(i2.reshape(N, C, H * W), axis=2)
        e1 = jnp.maximum(p1 @ w_e + b_emb, 0.0)
        e2 = jnp.maximum(p2 @ w_e + b_emb, 0.0)
        z = jnp.concatenate([e1, e2], axis=1)
        h1 = jnp.maximum(z @ w1f + b1, 0.0)
        h2 = jnp.maximum(h1 @ w2f + b2, 0.0)
        return h2 @ w3f + b3

    ref = reference(input1, input2)
    assert bool(jnp.allclose(out, ref, atol=2e-3, rtol=2e-2)), (out, ref)

    print("KERNEL_OK")
</pallas_src>

<mosaic_0001>
module attributes {stable_mosaic.version = 11 : i64} {
  func.func @siamese_fused_kernel(%arg0: memref<16x1024xbf16, #tpu.memory_space<vmem>>, %arg1: memref<1024x32xbf16, #tpu.memory_space<vmem>>, %arg2: memref<1x32xf32, #tpu.memory_space<vmem>>, %arg3: memref<32x256xbf16, #tpu.memory_space<vmem>>, %arg4: memref<32x256xbf16, #tpu.memory_space<vmem>>, %arg5: memref<1x256xf32, #tpu.memory_space<vmem>>, %arg6: memref<256x256xbf16, #tpu.memory_space<vmem>>, %arg7: memref<1x256xf32, #tpu.memory_space<vmem>>, %arg8: memref<256x128xbf16, #tpu.memory_space<vmem>>, %arg9: memref<1x1xf32, #tpu.memory_space<smem>>, %arg10: memref<8x128xf32, #tpu.memory_space<vmem>>) attributes {dimension_semantics = [], scalar_prefetch = 0 : i64, scratch_operands = 0 : i64, tpu.core_type = #tpu.core_type<tc>} {
    %c0 = arith.constant 0 : index
    %c0_0 = arith.constant 0 : index
    %0 = vector.load %arg0[%c0, %c0_0] : memref<16x1024xbf16, #tpu.memory_space<vmem>>, vector<16x1024xbf16>
    %c0_1 = arith.constant 0 : index
    %c0_2 = arith.constant 0 : index
    %1 = vector.load %arg1[%c0_1, %c0_2] : memref<1024x32xbf16, #tpu.memory_space<vmem>>, vector<1024x32xbf16>
    %cst = arith.constant dense<0.000000e+00> : vector<16x32xf32>
    %2 = tpu.matmul %0, %1, %cst {dimension_numbers = #tpu.dot_dimension_numbers<[1], [0], [0], [1], [0, 0, 1, 1], [], []>} : vector<16x1024xbf16>, vector<1024x32xbf16>, vector<16x32xf32> -> vector<16x32xf32>
    %c0_3 = arith.constant 0 : index
    %c0_4 = arith.constant 0 : index
    %3 = vector.load %arg2[%c0_3, %c0_4] : memref<1x32xf32, #tpu.memory_space<vmem>>, vector<1x32xf32>
    %4 = vector.broadcast %3 : vector<1x32xf32> to vector<16x32xf32>
    %5 = arith.addf %2, %4 : vector<16x32xf32>
    %cst_5 = arith.constant 0.000000e+00 : f32
    %6 = vector.broadcast %cst_5 : f32 to vector<16x32xf32>
    %7 = arith.maximumf %5, %6 : vector<16x32xf32>
    %8 = arith.truncf %7 : vector<16x32xf32> to vector<16x32xbf16>
    %9 = vector.extract_strided_slice %8 {offsets = [0, 0], sizes = [8, 32], strides = [1, 1]} : vector<16x32xbf16> to vector<8x32xbf16>
    %10 = vector.extract_strided_slice %8 {offsets = [8, 0], sizes = [8, 32], strides = [1, 1]} : vector<16x32xbf16> to vector<8x32xbf16>
    %c0_6 = arith.constant 0 : index
    %c0_7 = arith.constant 0 : index
    %11 = vector.load %arg3[%c0_6, %c0_7] : memref<32x256xbf16, #tpu.memory_space<vmem>>, vector<32x256xbf16>
    %cst_8 = arith.constant dense<0.000000e+00> : vector<8x256xf32>
    %12 = tpu.matmul %9, %11, %cst_8 {dimension_numbers = #tpu.dot_dimension_numbers<[1], [0], [0], [1], [0, 0, 1, 1], [], []>} : vector<8x32xbf16>, vector<32x256xbf16>, vector<8x256xf32> -> vector<8x256xf32>
    %c0_9 = arith.constant 0 : index
    %c0_10 = arith.constant 0 : index
    %13 = vector.load %arg4[%c0_9, %c0_10] : memref<32x256xbf16, #tpu.memory_space<vmem>>, vector<32x256xbf16>
    %cst_11 = arith.constant dense<0.000000e+00> : vector<8x256xf32>
    %14 = tpu.matmul %10, %13, %cst_11 {dimension_numbers = #tpu.dot_dimension_numbers<[1], [0], [0], [1], [0, 0, 1, 1], [], []>} : vector<8x32xbf16>, vector<32x256xbf16>, vector<8x256xf32> -> vector<8x256xf32>
    %15 = arith.addf %12, %14 : vector<8x256xf32>
    %c0_12 = arith.constant 0 : index
    %c0_13 = arith.constant 0 : index
    %16 = vector.load %arg5[%c0_12, %c0_13] : memref<1x256xf32, #tpu.memory_space<vmem>>, vector<1x256xf32>
    %17 = vector.broadcast %16 : vector<1x256xf32> to vector<8x256xf32>
    %18 = arith.addf %15, %17 : vector<8x256xf32>
    %cst_14 = arith.constant 0.000000e+00 : f32
    %19 = vector.broadcast %cst_14 : f32 to vector<8x256xf32>
    %20 = arith.maximumf %18, %19 : vector<8x256xf32>
    %21 = arith.truncf %20 : vector<8x256xf32> to vector<8x256xbf16>
    %c0_15 = arith.constant 0 : index
    %c0_16 = arith.constant 0 : index
    %22 = vector.load %arg6[%c0_15, %c0_16] : memref<256x256xbf16, #tpu.memory_space<vmem>>, vector<256x256xbf16>
    %cst_17 = arith.constant dense<0.000000e+00> : vector<8x256xf32>
    %23 = tpu.matmul %21, %22, %cst_17 {dimension_numbers = #tpu.dot_dimension_numbers<[1], [0], [0], [1], [0, 0, 1, 1], [], []>} : vector<8x256xbf16>, vector<256x256xbf16>, vector<8x256xf32> -> vector<8x256xf32>
    %c0_18 = arith.constant 0 : index
    %c0_19 = arith.constant 0 : index
    %24 = vector.load %arg7[%c0_18, %c0_19] : memref<1x256xf32, #tpu.memory_space<vmem>>, vector<1x256xf32>
    %25 = vector.broadcast %24 : vector<1x256xf32> to vector<8x256xf32>
    %26 = arith.addf %23, %25 : vector<8x256xf32>
    %cst_20 = arith.constant 0.000000e+00 : f32
    %27 = vector.broadcast %cst_20 : f32 to vector<8x256xf32>
    %28 = arith.maximumf %26, %27 : vector<8x256xf32>
    %29 = arith.truncf %28 : vector<8x256xf32> to vector<8x256xbf16>
    %c0_21 = arith.constant 0 : index
    %c0_22 = arith.constant 0 : index
    %30 = vector.load %arg8[%c0_21, %c0_22] : memref<256x128xbf16, #tpu.memory_space<vmem>>, vector<256x128xbf16>
    %cst_23 = arith.constant dense<0.000000e+00> : vector<8x128xf32>
    %31 = tpu.matmul %29, %30, %cst_23 {dimension_numbers = #tpu.dot_dimension_numbers<[1], [0], [0], [1], [0, 0, 1, 1], [], []>} : vector<8x256xbf16>, vector<256x128xbf16>, vector<8x128xf32> -> vector<8x128xf32>
    %c0_24 = arith.constant 0 : index
    %c0_25 = arith.constant 0 : index
    %32 = memref.load %arg9[%c0_24, %c0_25] : memref<1x1xf32, #tpu.memory_space<smem>>
    %33 = vector.broadcast %32 : f32 to vector<8x128xf32>
    %34 = arith.addf %31, %33 : vector<8x128xf32>
    %c0_26 = arith.constant 0 : index
    %c0_27 = arith.constant 0 : index
    %35 = vector.load %arg10[%c0_26, %c0_27] : memref<8x128xf32, #tpu.memory_space<vmem>>, vector<8x128xf32>
    tpu.vector_store %arg10[%c0_26, %c0_27], %34 {strides = array<i32>} : memref<8x128xf32, #tpu.memory_space<vmem>>, vector<8x128xf32>,
    return
  }
}

</mosaic_0001>

<bundles_post_ra>
// kernel: siamese_forward.1
= control target key start
LH: loop header
LB: loop body
LE: loop exit
PB: predicated region body
PF: predicated region fallthrough
CT: control target
= control target key end

     0   :  { %vm801_vm0 = vcmask 261120   ;;  %s2191_s1 = inlined_call_operand.vmem [shape: bf16[1024,32], index: 1, kind: input, shape index: {}]   ;;  %s2192_s0 = inlined_call_operand.vmem [shape: bf16[16,1024], index: 0, kind: input, shape index: {}]   ;;  %s2193_s4 = inlined_call_operand.vmem [shape: bf16[32,256], index: 4, kind: input, shape index: {}]   ;;  %s2194_s3 = inlined_call_operand.vmem [shape: bf16[32,256], index: 3, kind: input, shape index: {}]   ;;  %s2195_s6 = inlined_call_operand.vmem [shape: bf16[256,256], index: 6, kind: input, shape index: {}]   ;;  %s2196_s2 = inlined_call_operand.vmem [shape: f32[1,32], index: 2, kind: input, shape index: {}]   ;;  %s2197_s8 = inlined_call_operand.vmem [shape: bf16[256,128], index: 8, kind: input, shape index: {}]   ;;  %s2198_s5 = inlined_call_operand.vmem [shape: f32[1,256], index: 5, kind: input, shape index: {}]   ;;  %s2199_s7 = inlined_call_operand.vmem [shape: f32[1,256], index: 7, kind: input, shape index: {}]   ;;  %s2200_s9 = inlined_call_operand.<no memory space> [shape: f32[1,1], index: 9, kind: input, shape index: {}]   ;;  %s2201_s10 = inlined_call_operand.vmem [shape: f32[8,128], index: 10, kind: output, shape index: {}]  }
   0x1   :  { %v1594_v0 = vld [vmem:[%s2191_s1 + $0x40] sm:$0xff]   ;;  %v1598_v4 = vld [vmem:[%s2191_s1 + $0x48] sm:$0xff]   ;;  %v1602_v8 = vld [vmem:[%s2191_s1 + $0x50] sm:$0xff]  }
   0x2   :  { %v1595_v1 = vld [vmem:[%s2191_s1 + $0xc0] sm:$0xff]   ;;  %1483 = vmatprep.subr.bf16.mxu0 %v1594_v0  ;;  %v1599_v5 = vld [vmem:[%s2191_s1 + $0xc8] sm:$0xff]   ;;  %v1603_v9 = vld [vmem:[%s2191_s1 + $0xd0] sm:$0xff]  }
   0x3   :  { %v1596_v2 = vld [vmem:[%s2191_s1] sm:$0xff]   ;;  %1505 = vmatprep.subr.bf16.mxu1 %v1595_v1  ;;  %v1600_v6 = vld [vmem:[%s2191_s1 + $0x8] sm:$0xff]   ;;  %v1604_v10 = vld [vmem:[%s2191_s1 + $0x10] sm:$0xff]  }
   0x4   :  { %v1597_v3 = vld [vmem:[%s2191_s1 + $0x80] sm:$0xff]   ;;  %1484 = vmatpush3.bf16.msra.mxu0 %v1596_v2  ;;  %v1601_v7 = vld [vmem:[%s2191_s1 + $0x88] sm:$0xff]   ;;  %v1605_v11 = vld [vmem:[%s2191_s1 + $0x90] sm:$0xff]  }
   0x5   :  { %1506 = vmatpush3.bf16.msra.mxu1 %v1597_v3  ;;  %1485 = vmatprep.subr.bf16.mxu0 %v1598_v4  ;;  %v1606_v12 = vld [vmem:[%s2191_s1 + $0x58] sm:$0xff]   ;;  %v1610_v16 = vld [vmem:[%s2191_s1 + $0x60] sm:$0xff]   ;;  %v1614_v20 = vld [vmem:[%s2191_s1 + $0x68] sm:$0xff]  }
   0x6   :  { %1507 = vmatprep.subr.bf16.mxu1 %v1599_v5  ;;  %v1607_v13 = vld [vmem:[%s2191_s1 + $0xd8] sm:$0xff]   ;;  %v1611_v17 = vld [vmem:[%s2191_s1 + $0xe0] sm:$0xff]   ;;  %v1615_v21 = vld [vmem:[%s2191_s1 + $0xe8] sm:$0xff]  }
   0x7   :  { %v1608_v14 = vld [vmem:[%s2191_s1 + $0x18] sm:$0xff]   ;;  %v1612_v18 = vld [vmem:[%s2191_s1 + $0x20] sm:$0xff]   ;;  %v1616_v22 = vld [vmem:[%s2191_s1 + $0x28] sm:$0xff]  }
   0x8   :  { %1486 = vmatpush3.bf16.msra.mxu0 %v1600_v6  ;;  %v1609_v15 = vld [vmem:[%s2191_s1 + $0x98] sm:$0xff]   ;;  %v1613_v19 = vld [vmem:[%s2191_s1 + $0xa0] sm:$0xff]   ;;  %v1617_v23 = vld [vmem:[%s2191_s1 + $0xa8] sm:$0xff]  }
   0x9   :  { %1508 = vmatpush3.bf16.msra.mxu1 %v1601_v7  ;;  %1487 = vmatprep.subr.bf16.mxu0 %v1602_v8  ;;  %v1618_v24 = vld [vmem:[%s2191_s1 + $0x70] sm:$0xff]   ;;  %v1622_v28 = vld [vmem:[%s2191_s1 + $0x78] sm:$0xff]   ;;  %v37_v32 = vld [vmem:[%s2192_s0] sm:$0xff] }
   0xa   :  { %1509 = vmatprep.subr.bf16.mxu1 %v1603_v9  ;;  %v1619_v25 = vld [vmem:[%s2191_s1 + $0xf0] sm:$0xff]   ;;  %v1623_v29 = vld [vmem:[%s2191_s1 + $0xf8] sm:$0xff]   ;;  %v41_v33 = vld [vmem:[%s2192_s0 + $0x20] sm:$0xff] }
   0xb   :  { %v1620_v26 = vld [vmem:[%s2191_s1 + $0x30] sm:$0xff]   ;;  %v1624_v30 = vld [vmem:[%s2191_s1 + $0x38] sm:$0xff]   ;;  %v38_v34 = vld [vmem:[%s2192_s0 + $0x8] sm:$0xff]  ;;  %v1353_v35 = vcombine.low %v37_v32, %v41_v33  ;;  %v1354_v36 = vcombine.high %v37_v32, %v41_v33 }
   0xc   :  { %1488 = vmatpush3.bf16.msra.mxu0 %v1604_v10  ;;  %v1621_v27 = vld [vmem:[%s2191_s1 + $0xb0] sm:$0xff]   ;;  %v1625_v31 = vld [vmem:[%s2191_s1 + $0xb8] sm:$0xff]   ;;  %v42_v37 = vld [vmem:[%s2192_s0 + $0x28] sm:$0xff] }
   0xd   :  { %1510 = vmatpush3.bf16.msra.mxu1 %v1605_v11  ;;  %1489 = vmatprep.subr.bf16.mxu0 %v1606_v12  ;;  %v1355_v38 = vcombine.low %v38_v34, %v42_v37  ;;  %v1356_v39 = vcombine.high %v38_v34, %v42_v37  ;;  %v1626_v40 = vld [vmem:[%s2191_s1 + $0x140] sm:$0xff]   ;;  %v1630_v44 = vld [vmem:[%s2191_s1 + $0x148] sm:$0xff]   ;;  %v1634_v48 = vld [vmem:[%s2191_s1 + $0x150] sm:$0xff]  }
   0xe   :  { %1511 = vmatprep.subr.bf16.mxu1 %v1607_v13  ;;  %636 = vmatprep.mubr.bf16.mxu0 %v1354_v36  ;;  %v1627_v41 = vld [vmem:[%s2191_s1 + $0x1c0] sm:$0xff]   ;;  %v1631_v45 = vld [vmem:[%s2191_s1 + $0x1c8] sm:$0xff]   ;;  %v1635_v49 = vld [vmem:[%s2191_s1 + $0x1d0] sm:$0xff]  }
   0xf   :  { %677 = vmatprep.mubr.bf16.mxu1 %v1356_v39  ;;  %v1628_v42 = vld [vmem:[%s2191_s1 + $0x100] sm:$0xff]   ;;  %v1632_v46 = vld [vmem:[%s2191_s1 + $0x108] sm:$0xff]   ;;  %v1636_v50 = vld [vmem:[%s2191_s1 + $0x110] sm:$0xff]  }
  0x10   :  { %1490 = vmatpush3.bf16.msra.mxu0 %v1608_v14  ;;  %v1629_v43 = vld [vmem:[%s2191_s1 + $0x180] sm:$0xff]   ;;  %v1633_v47 = vld [vmem:[%s2191_s1 + $0x188] sm:$0xff]   ;;  %v1637_v51 = vld [vmem:[%s2191_s1 + $0x190] sm:$0xff]  }
  0x11   :  { %1512 = vmatpush3.bf16.msra.mxu1 %v1609_v15  ;;  %1491 = vmatprep.subr.bf16.mxu0 %v1610_v16  ;;  %v1638_v52 = vld [vmem:[%s2191_s1 + $0x158] sm:$0xff]   ;;  %v1642_v56 = vld [vmem:[%s2191_s1 + $0x160] sm:$0xff]   ;;  %v1646_v60 = vld [vmem:[%s2191_s1 + $0x168] sm:$0xff]  }
  0x12   :  { %1513 = vmatprep.subr.bf16.mxu1 %v1611_v17  ;;  %v1639_v53 = vld [vmem:[%s2191_s1 + $0x1d8] sm:$0xff]   ;;  %v1643_v57 = vld [vmem:[%s2191_s1 + $0x1e0] sm:$0xff]   ;;  %v1647_v61 = vld [vmem:[%s2191_s1 + $0x1e8] sm:$0xff]  }
  0x13   :  { %v1640_v54 = vld [vmem:[%s2191_s1 + $0x118] sm:$0xff]   ;;  %v1644_v58 = vld [vmem:[%s2191_s1 + $0x120] sm:$0xff]   ;;  %v1648_v62 = vld [vmem:[%s2191_s1 + $0x128] sm:$0xff]  }
  0x14   :  { %1492 = vmatpush3.bf16.msra.mxu0 %v1612_v18  ;;  %v1641_v55 = vld [vmem:[%s2191_s1 + $0x198] sm:$0xff]   ;;  %v1645_v59 = vld [vmem:[%s2191_s1 + $0x1a0] sm:$0xff]   ;;  %v1649_v63 = vld [vmem:[%s2191_s1 + $0x1a8] sm:$0xff]  }
  0x15   :  { %1514 = vmatpush3.bf16.msra.mxu1 %v1613_v19  ;;  %1493 = vmatprep.subr.bf16.mxu0 %v1614_v20  ;;  %v1650_v0 = vld [vmem:[%s2191_s1 + $0x170] sm:$0xff]   ;;  %v1654_v4 = vld [vmem:[%s2191_s1 + $0x178] sm:$0xff]   ;;  %v1660_v16 = vld [vmem:[%s2193_s4 + $0x4] ss:$8 sps:$4 sm:$0xff]   ;;  %v1734_v20 = vmov 0  }
  0x16   :  { %1515 = vmatprep.subr.bf16.mxu1 %v1615_v21  ;;  %v1651_v1 = vld [vmem:[%s2191_s1 + $0x1f0] sm:$0xff]   ;;  %v1655_v5 = vld [vmem:[%s2191_s1 + $0x1f8] sm:$0xff]   ;;  %v1658_v17 = vld [vmem:[%s2193_s4] ss:$8 sps:$4 sm:$0xff]  }
  0x17   :  { %v1652_v2 = vld [vmem:[%s2191_s1 + $0x130] sm:$0xff]   ;;  %v1656_v6 = vld [vmem:[%s2191_s1 + $0x138] sm:$0xff]   ;;  %v1666_v21 = vld [vmem:[%s2194_s3 + $0x4] ss:$8 sps:$4 sm:$0xff]  }
  0x18   :  { %1494 = vmatpush3.bf16.msra.mxu0 %v1616_v22  ;;  %v1653_v3 = vld [vmem:[%s2191_s1 + $0x1b0] sm:$0xff]   ;;  %v1657_v7 = vld [vmem:[%s2191_s1 + $0x1b8] sm:$0xff]   ;;  %v1670_v22 = vld [vmem:[%s2195_s6] ss:$8 sps:$4 sm:$0xff]  }
  0x19   :  { %1516 = vmatpush3.bf16.msra.mxu1 %v1617_v23  ;;  %1495 = vmatprep.subr.bf16.mxu0 %v1618_v24  ;;  %v39_v8 = vld [vmem:[%s2192_s0 + $0x10] sm:$0xff]  ;;  %v40_v12 = vld [vmem:[%s2192_s0 + $0x18] sm:$0xff]  ;;  %v1672_v23 = vld [vmem:[%s2195_s6 + $0x4] ss:$8 sps:$4 sm:$0xff]  }
  0x1a   :  { %1517 = vmatprep.subr.bf16.mxu1 %v1619_v25  ;;  %v43_v9 = vld [vmem:[%s2192_s0 + $0x30] sm:$0xff]  ;;  %v44_v13 = vld [vmem:[%s2192_s0 + $0x38] sm:$0xff]  ;;  %v1690_v34 = vld [vmem:[%s2195_s6 + $0x64] ss:$8 sps:$4 sm:$0xff]  }
  0x1b   :  { %v1357_v10 = vcombine.low %v39_v8, %v43_v9  ;;  %v1358_v11 = vcombine.high %v39_v8, %v43_v9  ;;  %v1359_v14 = vcombine.low %v40_v12, %v44_v13  ;;  %v1360_v15 = vcombine.high %v40_v12, %v44_v13  ;;  %v1663_v18 = vld [vmem:[%s2193_s4 + $0x14] ss:$8 sps:$4 sm:$0xff]   ;;  %v1661_v19 = vld [vmem:[%s2193_s4 + $0x10] ss:$8 sps:$4 sm:$0xff]   ;;  %v1694_v39 = vld [vmem:[%s2195_s6 + $0x80] ss:$8 sps:$4 sm:$0xff]  }
  0x1c   :  { %1496 = vmatpush3.bf16.msra.mxu0 %v1620_v26  ;;  %v1675_v24 = vld [vmem:[%s2195_s6 + $0x14] ss:$8 sps:$4 sm:$0xff]   ;;  %v1673_v25 = vld [vmem:[%s2195_s6 + $0x10] ss:$8 sps:$4 sm:$0xff]   ;;  %v1678_v26 = vld [vmem:[%s2195_s6 + $0x24] ss:$8 sps:$4 sm:$0xff]  }
  0x1d   :  { %1518 = vmatpush3.bf16.msra.mxu1 %v1621_v27  ;;  %1497 = vmatprep.subr.bf16.mxu0 %v1622_v28  ;;  %v1676_v27 = vld [vmem:[%s2195_s6 + $0x20] ss:$8 sps:$4 sm:$0xff]   ;;  %v1681_v28 = vld [vmem:[%s2195_s6 + $0x34] ss:$8 sps:$4 sm:$0xff]   ;;  %v1685_v33 = vld [vmem:[%s2195_s6 + $0x50] ss:$8 sps:$4 sm:$0xff]  }
  0x1e   :  { %1519 = vmatprep.subr.bf16.mxu1 %v1623_v29  ;;  %v1679_v29 = vld [vmem:[%s2195_s6 + $0x30] ss:$8 sps:$4 sm:$0xff]   ;;  %v1687_v32 = vld [vmem:[%s2195_s6 + $0x54] ss:$8 sps:$4 sm:$0xff]  }
  0x1f   :  { %v1693_v36 = vld [vmem:[%s2195_s6 + $0x74] ss:$8 sps:$4 sm:$0xff]   ;;  %v1691_v37 = vld [vmem:[%s2195_s6 + $0x70] ss:$8 sps:$4 sm:$0xff]  }
  0x20   :  { %1498 = vmatpush3.bf16.msra.mxu0 %v1624_v30  ;;  %v1684_v30 = vld [vmem:[%s2195_s6 + $0x44] ss:$8 sps:$4 sm:$0xff]  }
  0x21   :  { %1520 = vmatpush3.bf16.msra.mxu1 %v1625_v31  ;;  %1527 = vmatprep.subr.bf16.mxu0 %v1626_v40  ;;  %v1682_v31 = vld [vmem:[%s2195_s6 + $0x40] ss:$8 sps:$4 sm:$0xff]   ;;  %v1699_v40 = vld [vmem:[%s2195_s6 + $0x94] ss:$8 sps:$4 sm:$0xff]  }
  0x22   :  { %1549 = vmatprep.subr.bf16.mxu1 %v1627_v41  ;;  %v1697_v41 = vld [vmem:[%s2195_s6 + $0x90] ss:$8 sps:$4 sm:$0xff]  }
  0x23   :  { %637 = vmatmul.mubr.bf16.vlgmr.msra.gmra.mrb[0].mxu0 %v1353_v35  ;;  %v1688_v35 = vld [vmem:[%s2195_s6 + $0x60] ss:$8 sps:$4 sm:$0xff]  }
  0x24   :  { %678 = vmatmul.mubr.bf16.vlgmr.msra.gmra.mrb[0].mxu1 %v1355_v38  ;;  %1528 = vmatpush3.bf16.msra.mxu0 %v1628_v42  ;;  %v1696_v38 = vld [vmem:[%s2195_s6 + $0x84] ss:$8 sps:$4 sm:$0xff]  }
  0x25   :  { %1550 = vmatpush3.bf16.msra.mxu1 %v1629_v43  ;;  %1529 = vmatprep.subr.bf16.mxu0 %v1630_v44  ;;  %v1702_v42 = vld [vmem:[%s2195_s6 + $0xa4] ss:$8 sps:$4 sm:$0xff]   ;;  %v1700_v43 = vld [vmem:[%s2195_s6 + $0xa0] ss:$8 sps:$4 sm:$0xff]   ;;  %v1705_v44 = vld [vmem:[%s2195_s6 + $0xb4] ss:$8 sps:$4 sm:$0xff]  }
  0x26   :  { %1551 = vmatprep.subr.bf16.mxu1 %v1631_v45  ;;  %718 = vmatprep.mubr.bf16.mxu0 %v1358_v11  ;;  %v1703_v45 = vld [vmem:[%s2195_s6 + $0xb0] ss:$8 sps:$4 sm:$0xff]  }
  0x27   :  { %759 = vmatprep.mubr.bf16.mxu1 %v1360_v15 }
  0x28   :  { %1530 = vmatpush3.bf16.msra.mxu0 %v1632_v46 }
  0x29   :  { %1552 = vmatpush3.bf16.msra.mxu1 %v1633_v47  ;;  %1531 = vmatprep.subr.bf16.mxu0 %v1634_v48  ;;  %v1352_v48 = vld [vmem:[%s2196_s2] ss:$0 sm:$0xff] }
  0x2a   :  { %1553 = vmatprep.subr.bf16.mxu1 %v1635_v49 }
  0x2c   :  { %1532 = vmatpush3.bf16.msra.mxu0 %v1636_v50 }
  0x2d   :  { %1554 = vmatpush3.bf16.msra.mxu1 %v1637_v51  ;;  %1533 = vmatprep.subr.bf16.mxu0 %v1638_v52 }
  0x2e   :  { %1555 = vmatprep.subr.bf16.mxu1 %v1639_v53 }
  0x30   :  { %1534 = vmatpush3.bf16.msra.mxu0 %v1640_v54 }
  0x31   :  { %1556 = vmatpush3.bf16.msra.mxu1 %v1641_v55  ;;  %1535 = vmatprep.subr.bf16.mxu0 %v1642_v56 }
  0x32   :  { %1557 = vmatprep.subr.bf16.mxu1 %v1643_v57 }
  0x34   :  { %1536 = vmatpush3.bf16.msra.mxu0 %v1644_v58 }
  0x35   :  { %1558 = vmatpush3.bf16.msra.mxu1 %v1645_v59  ;;  %1537 = vmatprep.subr.bf16.mxu0 %v1646_v60 }
  0x36   :  { %1559 = vmatprep.subr.bf16.mxu1 %v1647_v61 }
  0x38   :  { %1538 = vmatpush3.bf16.msra.mxu0 %v1648_v62 }
  0x39   :  { %1560 = vmatpush3.bf16.msra.mxu1 %v1649_v63  ;;  %1539 = vmatprep.subr.bf16.mxu0 %v1650_v0 }
  0x3a   :  { %1561 = vmatprep.subr.bf16.mxu1 %v1651_v1 }
  0x3c   :  { %1540 = vmatpush3.bf16.msra.mxu0 %v1652_v2 }
  0x3d   :  { %1562 = vmatpush3.bf16.msra.mxu1 %v1653_v3  ;;  %1541 = vmatprep.subr.bf16.mxu0 %v1654_v4 }
  0x3e   :  { %1563 = vmatprep.subr.bf16.mxu1 %v1655_v5 }
  0x40   :  { %1542 = vmatpush3.bf16.msra.mxu0 %v1656_v6 }
  0x41   :  { %1564 = vmatpush3.bf16.msra.mxu1 %v1657_v7  ;;  %1132 = vmatprep.subr.bf16.mxu0 %v1672_v23  ;;  %v1708_v23 = vld [vmem:[%s2195_s6 + $0xc4] ss:$8 sps:$4 sm:$0xff]  }
  0x42   :  { %805 = vmatprep.subr.bf16.mxu1 %v1660_v16 }
  0x43   :  { %719 = vmatmul.mubr.bf16.vlgmr.msra.gmra.mrb[4].mxu0 %v1357_v10 }
  0x44   :  { %760 = vmatmul.mubr.bf16.vlgmr.msra.gmra.mrb[4].mxu1 %v1359_v14  ;;  %1133 = vmatpush1.bf16.msra.mxu0 %v1670_v22  ;;  %v1667_v22 = vld [vmem:[%s2194_s3 + $0x10] ss:$8 sps:$4 sm:$0xff]  }
  0x45   :  { %806 = vmatpush1.bf16.msra.mxu1 %v1658_v17  ;;  %837 = vmatprep.mubr.bf16.mxu1 %v1734_v20 }
  0x46   :  { %807 = vmatprep.subr.bf16.mxu1 %v1663_v18  ;;  %1134 = vmatprep.subr.bf16.mxu0 %v1675_v24  ;;  %v1664_v18 = vld [vmem:[%s2194_s3] ss:$8 sps:$4 sm:$0xff]  }
  0x47   :  { %v1706_v24 = vld [vmem:[%s2195_s6 + $0xc0] ss:$8 sps:$4 sm:$0xff]  }
  0x48   :  { %1135 = vmatpush1.bf16.msra.mxu0 %v1673_v25  ;;  %v1711_v25 = vld [vmem:[%s2195_s6 + $0xd4] ss:$8 sps:$4 sm:$0xff]  }
  0x49   :  { %808 = vmatpush1.bf16.msra.mxu1 %v1661_v19  ;;  %1136 = vmatprep.subr.bf16.mxu0 %v1678_v26  ;;  %v1714_v26 = vld [vmem:[%s2195_s6 + $0xe4] ss:$8 sps:$4 sm:$0xff]  }
  0x4a   :  { %869 = vmatprep.subr.bf16.mxu1 %v1666_v21  ;;  %v1669_v21 = vld [vmem:[%s2194_s3 + $0x14] ss:$8 sps:$4 sm:$0xff]  }
  0x4c   :  { %1137 = vmatpush1.bf16.msra.mxu0 %v1676_v27  ;;  %v1712_v27 = vld [vmem:[%s2195_s6 + $0xe0] ss:$8 sps:$4 sm:$0xff]  }
  0x4d   :  { %1138 = vmatprep.subr.bf16.mxu0 %v1681_v28  ;;  %v1717_v28 = vld [vmem:[%s2195_s6 + $0xf4] ss:$8 sps:$4 sm:$0xff]  }
  0x50   :  { %1139 = vmatpush1.bf16.msra.mxu0 %v1679_v29  ;;  %v1715_v29 = vld [vmem:[%s2195_s6 + $0xf0] ss:$8 sps:$4 sm:$0xff]  }
  0x51   :  { %1140 = vmatprep.subr.bf16.mxu0 %v1684_v30  ;;  %v1718_v30 = vld [vmem:[%s2197_s8 + $0x40] sm:$0xff]  }
  0x54   :  { %1141 = vmatpush1.bf16.msra.mxu0 %v1682_v31  ;;  %v1719_v31 = vld [vmem:[%s2197_s8] sm:$0xff]  }
  0x55   :  { %1142 = vmatprep.subr.bf16.mxu0 %v1687_v32  ;;  %v1720_v32 = vld [vmem:[%s2197_s8 + $0x48] sm:$0xff]  }
  0x58   :  { %1143 = vmatpush1.bf16.msra.mxu0 %v1685_v33  ;;  %v1721_v33 = vld [vmem:[%s2197_s8 + $0x8] sm:$0xff]  }
  0x59   :  { %1144 = vmatprep.subr.bf16.mxu0 %v1690_v34  ;;  %v1722_v34 = vld [vmem:[%s2197_s8 + $0x50] sm:$0xff]  }
  0x5c   :  { %1145 = vmatpush1.bf16.msra.mxu0 %v1688_v35  ;;  %v1723_v35 = vld [vmem:[%s2197_s8 + $0x10] sm:$0xff]  }
  0x5d   :  { %1146 = vmatprep.subr.bf16.mxu0 %v1693_v36  ;;  %v1724_v36 = vld [vmem:[%s2197_s8 + $0x58] sm:$0xff]  }
  0x60   :  { %1147 = vmatpush1.bf16.msra.mxu0 %v1691_v37  ;;  %v1725_v37 = vld [vmem:[%s2197_s8 + $0x18] sm:$0xff]  }
  0x61   :  { %1148 = vmatprep.subr.bf16.mxu0 %v1696_v38  ;;  %v1726_v38 = vld [vmem:[%s2197_s8 + $0x60] sm:$0xff]  }
  0x64   :  { %1149 = vmatpush1.bf16.msra.mxu0 %v1694_v39  ;;  %v1727_v39 = vld [vmem:[%s2197_s8 + $0x20] sm:$0xff]  }
  0x65   :  { %1150 = vmatprep.subr.bf16.mxu0 %v1699_v40  ;;  %v1728_v40 = vld [vmem:[%s2197_s8 + $0x68] sm:$0xff]  }
  0x68   :  { %1151 = vmatpush1.bf16.msra.mxu0 %v1697_v41  ;;  %v1729_v41 = vld [vmem:[%s2197_s8 + $0x28] sm:$0xff]  }
  0x69   :  { %1152 = vmatprep.subr.bf16.mxu0 %v1702_v42  ;;  %v912_v42 = vlaneseq }
  0x6c   :  { %1153 = vmatpush1.bf16.msra.mxu0 %v1700_v43  ;;  %v913_v43 = vshrl.u32 %v912_v42, 7 }
  0x6d   :  { %1154 = vmatprep.subr.bf16.mxu0 %v1705_v44 }
  0x70   :  { %1155 = vmatpush1.bf16.msra.mxu0 %v1703_v45 }
  0x71   :  { %1156 = vmatprep.subr.bf16.mxu0 %v1708_v23 }
  0x74   :  { %1157 = vmatpush1.bf16.msra.mxu0 %v1706_v24 }
  0x75   :  { %1158 = vmatprep.subr.bf16.mxu0 %v1711_v25 }
  0xf6   :  { %v1499_v46 = vpop.f32.mrb[0].mxu0 }
  0xf7   :  { %v1521_v47 = vpop.f32.mrb[0].mxu1  ;;  %v1500_v49 = vpop.f32.mrb[1].mxu0 }
  0xf8   :  { %v1501_v50 = vadd.f32 %v1500_v49, %v1499_v46  ;;  %v1522_v51 = vpop.f32.mrb[1].mxu1  ;;  %v1502_v52 = vpop.f32.mrb[2].mxu0  ;;  %v910_v49 = vld [vmem:[%s2198_s5] sm:$0x3] }
  0xf9   :  { %v1523_v53 = vadd.f32 %v1522_v51, %v1521_v47  ;;  %v1524_v54 = vpop.f32.mrb[2].mxu1  ;;  %v1503_v55 = vpop.f32.mrb[3].mxu0 }
  0xfa   :  { %v639_v56 = vadd.f32 %v1501_v50, %v1352_v48  ;;  %v1504_v57 = vadd.f32 %v1503_v55, %v1502_v52  ;;  %v1525_v58 = vpop.f32.mrb[3].mxu1  ;;  %v918_v50 = vsub.s32 1, %v913_v43 }
  0xfb   :  { %v1526_v59 = vadd.f32 %v1525_v58, %v1524_v54 }
  0xfc   :  { %v680_v60 = vadd.f32 %v1523_v53, %v639_v56  ;;  %v642_v61 = vadd.f32 %v1504_v57, %v1352_v48  ;;  %v914_v48 = vsub.s32 0, %v913_v43  ;;  %v919_v53 = vrot.slane %v910_v49, %v918_v50 }
  0xfe   :  { %v683_v62 = vadd.f32 %v1526_v59, %v642_v61  ;;  %v915_v51 = vrot.slane %v910_v49, %v914_v48 }
 0x116   :  { %v1543_v63 = vpop.f32.mrb[4].mxu0 }
 0x117   :  { %v1565_v0 = vpop.f32.mrb[4].mxu1  ;;  %v1544_v1 = vpop.f32.mrb[5].mxu0 }
 0x118   :  { %v1545_v2 = vadd.f32 %v1544_v1, %v1543_v63  ;;  %v1566_v3 = vpop.f32.mrb[5].mxu1  ;;  %v1546_v4 = vpop.f32.mrb[6].mxu0  ;;  %v1730_v1 = vld [vmem:[%s2197_s8 + $0x70] sm:$0xff]  }
 0x119   :  { %v1567_v5 = vadd.f32 %v1566_v3, %v1565_v0  ;;  %v1568_v6 = vpop.f32.mrb[6].mxu1  ;;  %v1547_v7 = vpop.f32.mrb[7].mxu0  ;;  %v1732_v3 = vld [vmem:[%s2197_s8 + $0x78] sm:$0xff]  }
 0x11a   :  { %v721_v8 = vadd.f32 %v1545_v2, %v680_v60  ;;  %v1548_v9 = vadd.f32 %v1547_v7, %v1546_v4  ;;  %v1569_v10 = vpop.f32.mrb[7].mxu1  ;;  %v1731_v2 = vld [vmem:[%s2197_s8 + $0x30] sm:$0xff]   ;;  %v1733_v4 = vld [vmem:[%s2197_s8 + $0x38] sm:$0xff]  }
 0x11b   :  { %v1570_v11 = vadd.f32 %v1569_v10, %v1568_v6 }
 0x11c   :  { %v762_v12 = vadd.f32 %v1567_v5, %v721_v8  ;;  %v724_v13 = vadd.f32 %v1548_v9, %v683_v62  ;;  %v960_v5 = vld [vmem:[%s2199_s7] sm:$0x3] }
 0x11d   :  { %v965_v6 = vrot.slane %v960_v5, %v914_v48  ;;  %v969_v7 = vrot.slane %v960_v5, %v918_v50 }
 0x11e   :  { %v765_v14 = vadd.f32 %v1570_v11, %v724_v13  ;;  %v768_v15 = vmax.f32 %v762_v12, 0.0 }
 0x120   :  { %v769_v16 = vmax.f32 %v765_v14, 0.0 }
 0x122   :  { %v770_v17 = vpack.c.bf16 %v769_v16, %v768_v15 }
 0x124   :  { %v780_v19 = vrot.slane %v770_v17, 4 }
 0x126   :  { %1429 = vmatmul.mubr.msk.bf16.vlgmr.msra.gmra.mrb[8].mxu1 %vm801_vm0, %v780_v19  ;;  %v1210_v19 = vstv %s2200_s9 }
 0x127   :  { %870 = vmatpush1.bf16.msra.mxu1 %v1664_v18  ;;  %901 = vmatprep.mubr.bf16.mxu1 %v1734_v20  ;;  %v1709_v20 = vld [vmem:[%s2195_s6 + $0xd0] ss:$8 sps:$4 sm:$0xff]  }
 0x128   :  { %871 = vmatprep.subr.bf16.mxu1 %v1669_v21  ;;  %1159 = vmatpush1.bf16.msra.mxu0 %v1709_v20 }
 0x129   :  { %1160 = vmatprep.subr.bf16.mxu0 %v1714_v26 }
 0x12b   :  { %872 = vmatpush1.bf16.msra.mxu1 %v1667_v22 }
 0x12c   :  { %1161 = vmatpush1.bf16.msra.mxu0 %v1712_v27  ;;  %1571 = vmatprep.subr.bf16.mxu1 %v1718_v30 }
 0x12d   :  { %1162 = vmatprep.subr.bf16.mxu0 %v1717_v28 }
 0x12e   :  { %1434 = vmatmul.mubr.msk.bf16.vlgmr.msra.gmra.mrb[12].mxu1 %vm801_vm0, %v770_v17 }
 0x12f   :  { %1572 = vmatpush3.bf16.msra.mxu1 %v1719_v31 }
 0x130   :  { %1163 = vmatpush1.bf16.msra.mxu0 %v1715_v29  ;;  %1573 = vmatprep.subr.bf16.mxu1 %v1720_v32 }
 0x133   :  { %1574 = vmatpush3.bf16.msra.mxu1 %v1721_v33 }
 0x134   :  { %1575 = vmatprep.subr.bf16.mxu1 %v1722_v34 }
 0x137   :  { %1576 = vmatpush3.bf16.msra.mxu1 %v1723_v35 }
 0x138   :  { %1577 = vmatprep.subr.bf16.mxu1 %v1724_v36 }
 0x13b   :  { %1578 = vmatpush3.bf16.msra.mxu1 %v1725_v37 }
 0x13c   :  { %1579 = vmatprep.subr.bf16.mxu1 %v1726_v38 }
 0x13f   :  { %1580 = vmatpush3.bf16.msra.mxu1 %v1727_v39 }
 0x140   :  { %1581 = vmatprep.subr.bf16.mxu1 %v1728_v40 }
 0x143   :  { %1582 = vmatpush3.bf16.msra.mxu1 %v1729_v41 }
 0x144   :  { %1583 = vmatprep.subr.bf16.mxu1 %v1730_v1 }
 0x147   :  { %1584 = vmatpush3.bf16.msra.mxu1 %v1731_v2 }
 0x148   :  { %1585 = vmatprep.subr.bf16.mxu1 %v1732_v3 }
 0x14b   :  { %1586 = vmatpush3.bf16.msra.mxu1 %v1733_v4 }
 0x1f9   :  { %v839_v44 = vpop.f32.mrb[8].mxu1 }
 0x1fa   :  { %v841_v45 = vpop.f32.mrb[9].mxu1 }
 0x1fb   :  { %v843_v46 = vpop.f32.mrb[10].mxu1 }
 0x1fc   :  { %v844_v47 = vpop.f32.mrb[11].mxu1 }
 0x201   :  { %v903_v52 = vpop.f32.mrb[12].mxu1 }
 0x202   :  { %v904_v54 = vadd.f32 %v903_v52, %v839_v44  ;;  %v905_v55 = vpop.f32.mrb[13].mxu1 }
 0x203   :  { %v906_v56 = vadd.f32 %v905_v55, %v841_v45  ;;  %v907_v57 = vpop.f32.mrb[14].mxu1 }
 0x204   :  { %v922_v58 = vadd.f32 %v915_v51, %v904_v54  ;;  %v908_v59 = vpop.f32.mrb[15].mxu1 }
 0x205   :  { %v923_v60 = vadd.f32 %v919_v53, %v906_v56 }
 0x206   :  { %v924_v61 = vmax.f32 %v922_v58, 0.0 }
 0x207   :  { %v925_v62 = vmax.f32 %v923_v60, 0.0 }
 0x208   :  { %v926_v0 = vpack.c.bf16 %v924_v61, %v924_v61 }
 0x209   :  { %v927_v63 = vpack.c.bf16 %v925_v62, %v925_v62 }
 0x20b   :  { %1164 = vmatprep.mubr.bf16.mxu0 %v927_v63 }
 0x20c   :  { %1165 = vmatmul.mubr.bf16.vlgmr.msra.gmra.mrb[8].mxu0 %v926_v0 }
 0x2df   :  { %v1166_v8 = vpop.f32.mrb[8].mxu0 }
 0x2e0   :  { %v1167_v9 = vadd.f32 %v1166_v8, %v965_v6  ;;  %v1168_v10 = vpop.f32.mrb[9].mxu0 }
 0x2e1   :  { %v1169_v11 = vadd.f32 %v1168_v10, %v969_v7  ;;  %v1170_v12 = vpop.f32.mrb[10].mxu0 }
 0x2e2   :  { %v1173_v13 = vmax.f32 %v1167_v9, 0.0  ;;  %v1171_v14 = vpop.f32.mrb[11].mxu0 }
 0x2e3   :  { %v1174_v15 = vmax.f32 %v1169_v11, 0.0 }
 0x2e4   :  { %v1175_v17 = vpack.c.bf16 %v1173_v13, %v1173_v13 }
 0x2e5   :  { %v1176_v16 = vpack.c.bf16 %v1174_v15, %v1174_v15 }
 0x2e7   :  { %1339 = vmatprep.mubr.bf16.mxu1 %v1176_v16 }
 0x2e8   :  { %1340 = vmatmul.mubr.bf16.vlgmr.msra.gmra.mrb[16].mxu1 %v1175_v17 }
 0x3bb   :  { %v1587_v18 = vpop.f32.mrb[16].mxu1 }
 0x3bc   :  { %v1588_v21 = vpop.f32.mrb[17].mxu1 }
 0x3bd   :  { %v1589_v22 = vadd.f32 %v1588_v21, %v1587_v18  ;;  %v1590_v23 = vpop.f32.mrb[18].mxu1 }
 0x3be   :  { %v1591_v24 = vpop.f32.mrb[19].mxu1 }
 0x3bf   :  { %v1342_v25 = vadd.f32 %v1589_v22, %v1210_v19 }
 0x3c1   :  { %1347 = vst [vmem:[%s2201_s10] sm:$0xff] %v1342_v25 }

</bundles_post_ra>
